<compile_context>
chip_gen: v7x
topology: tpu7x:2x2x1
jax: 0.10.0
libtpu: 0.0.40
codegen_flags: <defaults>
</compile_context>

<pallas_src>
import functools
import math

import jax
import jax.numpy as jnp
from jax import lax
from jax.experimental import pallas as pl
from jax.experimental.pallas import tpu as pltpu


def _attention_kernel(e_ref, q_ref, wk_ref, bk_ref, wv_ref, bv_ref, o_ref, *,
                      inv_sqrt_h):
    """One batch element: e (N, F) -> h_att (1, H)."""
    e = e_ref[...]                                                    # (N, F)
    q = q_ref[...]                                                    # (1, H)

    # Fold q into the key projection (contract last dims -> no transposes):
    #   u = q @ Wk^T -> (1, F);  c = q . bk -> (1, 1);  scale folded in here.
    u = lax.dot_general(q, wk_ref[...], (((1,), (1,)), ((), ())),
                        preferred_element_type=jnp.float32) * inv_sqrt_h
    c = lax.dot_general(q, bk_ref[...], (((1,), (1,)), ((), ())),
                        preferred_element_type=jnp.float32) * inv_sqrt_h

    # scores_i = e_i . u + c  -> (1, N)
    scores = lax.dot_general(u, e, (((1,), (1,)), ((), ())),
                             preferred_element_type=jnp.float32) + c

    # Numerically stable softmax over lanes; denom is a scalar -> exact divide.
    m = jnp.max(scores, axis=-1, keepdims=True)
    p = jnp.exp(scores - m)
    attn = p / jnp.sum(p, axis=-1, keepdims=True)                     # (1, N)

    # Value projection + weighted sum (the only remaining "real" MXU work).
    v = jnp.dot(e, wv_ref[...], preferred_element_type=jnp.float32) + bv_ref[...]
    o_ref[...] = jnp.dot(attn, v, preferred_element_type=jnp.float32)  # (1, H)


def single_head_attention_batched(e, q, w_key, b_key, w_value, b_value):
    """Batched forward. e: (B, N, F); q: (H,); w_*: (F, H); b_*: (H,) -> (B, H)."""
    B, N, F = e.shape
    H = q.shape[0]

    def shared(shape):
        # Whole-array block, constant index -> fetched once, VMEM-resident.
        return pl.BlockSpec(shape, lambda b: (0,) * len(shape))

    out = pl.pallas_call(
        functools.partial(_attention_kernel, inv_sqrt_h=1.0 / math.sqrt(H)),
        out_shape=jax.ShapeDtypeStruct((B, 1, H), jnp.float32),
        grid=(B,),
        in_specs=[
            pl.BlockSpec((None, N, F), lambda b: (b, 0, 0)),   # e  (per-batch row)
            shared((1, H)),                                    # q        (shared)
            shared((F, H)),                                    # w_key    (shared)
            shared((1, H)),                                    # b_key    (shared)
            shared((F, H)),                                    # w_value  (shared)
            shared((1, H)),                                    # b_value  (shared)
        ],
        out_specs=pl.BlockSpec((None, 1, H), lambda b: (b, 0, 0)),
        compiler_params=pltpu.CompilerParams(
            dimension_semantics=("parallel",)),                # megacore on v7x
    )(e, q.reshape(1, H), w_key, b_key.reshape(1, H),
      w_value, b_value.reshape(1, H))
    return out.reshape(B, H)


def single_head_attention(e, q, w_key, b_key, w_value, b_value):
    """Module-equivalent forward: e (N, F) -> h_att (H,)."""
    return single_head_attention_batched(e[None], q, w_key, b_key,
                                         w_value, b_value)[0]


# ---------------------------------------------------------------------------
# Pure-JAX reference (mirrors the PyTorch module exactly)
# ---------------------------------------------------------------------------
def _reference(e, q, w_key, b_key, w_value, b_value):
    k = e @ w_key + b_key
    scores = (q @ k.T) / math.sqrt(k.shape[-1])
    attn = jax.nn.softmax(scores, axis=-1)
    v = e @ w_value + b_value
    return attn @ v


if __name__ == "__main__":
    B, N, F, H = 4, 16, 8, 32   # batch x (stocks, input_size), hidden_size

    key = jax.random.PRNGKey(0)
    k_e, k_q, k_wk, k_bk, k_wv, k_bv = jax.random.split(key, 6)

    # nn.Parameter(torch.randn(hidden_size))
    q = jax.random.normal(k_q, (H,), jnp.float32)

    # nn.Linear default init: U(-1/sqrt(fan_in), ...); weights stored
    # pre-transposed as (F, H) so the kernel does e @ W.
    bound = 1.0 / math.sqrt(F)
    w_key = jax.random.uniform(k_wk, (F, H), jnp.float32, -bound, bound)
    b_key = jax.random.uniform(k_bk, (H,), jnp.float32, -bound, bound)
    w_value = jax.random.uniform(k_wv, (F, H), jnp.float32, -bound, bound)
    b_value = jax.random.uniform(k_bv, (H,), jnp.float32, -bound, bound)

    e = jax.random.normal(k_e, (B, N, F), jnp.float32)

    # Batched kernel (one pallas_call, grid over B).
    h_att = single_head_attention_batched(e, q, w_key, b_key, w_value, b_value)
    h_att = jax.block_until_ready(h_att)

    h_ref = jax.vmap(
        lambda eb: _reference(eb, q, w_key, b_key, w_value, b_value))(e)
    assert h_att.shape == h_ref.shape, (h_att.shape, h_ref.shape)
    assert jnp.allclose(h_att, h_ref, atol=1e-3, rtol=1e-3), (h_att, h_ref)

    # Module-equivalent single-example path.
    h_one = single_head_attention(e[0], q, w_key, b_key, w_value, b_value)
    h_one = jax.block_until_ready(h_one)
    assert h_one.shape == (H,)
    assert jnp.allclose(h_one, h_ref[0], atol=1e-3, rtol=1e-3), (h_one, h_ref[0])

    print("KERNEL_OK")
</pallas_src>

<mosaic_0001>
module attributes {stable_mosaic.version = 11 : i64} {
  func.func @_attention_kernel(%arg0: i32, %arg1: memref<1x16x8xf32, #tpu.memory_space<vmem>>, %arg2: memref<1x32xf32, #tpu.memory_space<vmem>>, %arg3: memref<8x32xf32, #tpu.memory_space<vmem>>, %arg4: memref<1x32xf32, #tpu.memory_space<vmem>>, %arg5: memref<8x32xf32, #tpu.memory_space<vmem>>, %arg6: memref<1x32xf32, #tpu.memory_space<vmem>>, %arg7: memref<1x1x32xf32, #tpu.memory_space<vmem>>) attributes {dimension_semantics = [#tpu.dimension_semantics<parallel>], iteration_bounds = array<i64: 4>, scalar_prefetch = 0 : i64, scratch_operands = 0 : i64, tpu.core_type = #tpu.core_type<tc>, window_params = [{transform_indices = @transform_0, window_bounds = array<i64: 1, 16, 8>}, {pipeline_mode = #tpu.pipeline_mode<synchronous>, transform_indices = @transform_1, window_bounds = array<i64: 1, 32>}, {pipeline_mode = #tpu.pipeline_mode<synchronous>, transform_indices = @transform_2, window_bounds = array<i64: 8, 32>}, {pipeline_mode = #tpu.pipeline_mode<synchronous>, transform_indices = @transform_3, window_bounds = array<i64: 1, 32>}, {pipeline_mode = #tpu.pipeline_mode<synchronous>, transform_indices = @transform_4, window_bounds = array<i64: 8, 32>}, {pipeline_mode = #tpu.pipeline_mode<synchronous>, transform_indices = @transform_5, window_bounds = array<i64: 1, 32>}, {transform_indices = @transform_6, window_bounds = array<i64: 1, 1, 32>}]} {
    %c0 = arith.constant 0 : index
    %c0_0 = arith.constant 0 : index
    %c0_1 = arith.constant 0 : index
    %0 = vector.load %arg1[%c0, %c0_0, %c0_1] : memref<1x16x8xf32, #tpu.memory_space<vmem>>, vector<1x16x8xf32>
    %1 = vector.shape_cast %0 : vector<1x16x8xf32> to vector<16x8xf32>
    %c0_2 = arith.constant 0 : index
    %c0_3 = arith.constant 0 : index
    %2 = vector.load %arg2[%c0_2, %c0_3] : memref<1x32xf32, #tpu.memory_space<vmem>>, vector<1x32xf32>
    %c0_4 = arith.constant 0 : index
    %c0_5 = arith.constant 0 : index
    %3 = vector.load %arg3[%c0_4, %c0_5] : memref<8x32xf32, #tpu.memory_space<vmem>>, vector<8x32xf32>
    %cst = arith.constant dense<0.000000e+00> : vector<1x8xf32>
    %4 = tpu.matmul %2, %3, %cst {dimension_numbers = #tpu.dot_dimension_numbers<[1], [1], [0], [0], [0, 0, 1, 0], [], []>} : vector<1x32xf32>, vector<8x32xf32>, vector<1x8xf32> -> vector<1x8xf32>
    %cst_6 = arith.constant 0.176776692 : f32
    %5 = vector.broadcast %cst_6 : f32 to vector<1x8xf32>
    %6 = arith.mulf %4, %5 : vector<1x8xf32>
    %c0_7 = arith.constant 0 : index
    %c0_8 = arith.constant 0 : index
    %7 = vector.load %arg4[%c0_7, %c0_8] : memref<1x32xf32, #tpu.memory_space<vmem>>, vector<1x32xf32>
    %cst_9 = arith.constant dense<0.000000e+00> : vector<1x1xf32>
    %8 = tpu.matmul %2, %7, %cst_9 {dimension_numbers = #tpu.dot_dimension_numbers<[1], [1], [0], [0], [0, 0, 1, 0], [], []>} : vector<1x32xf32>, vector<1x32xf32>, vector<1x1xf32> -> vector<1x1xf32>
    %cst_10 = arith.constant 0.176776692 : f32
    %9 = vector.broadcast %cst_10 : f32 to vector<1x1xf32>
    %10 = arith.mulf %8, %9 : vector<1x1xf32>
    %cst_11 = arith.constant dense<0.000000e+00> : vector<1x16xf32>
    %11 = tpu.matmul %6, %1, %cst_11 {dimension_numbers = #tpu.dot_dimension_numbers<[1], [1], [0], [0], [0, 0, 1, 0], [], []>} : vector<1x8xf32>, vector<16x8xf32>, vector<1x16xf32> -> vector<1x16xf32>
    %12 = vector.broadcast %10 : vector<1x1xf32> to vector<1x16xf32>
    %13 = arith.addf %11, %12 : vector<1x16xf32>
    %cst_12 = arith.constant dense<0xFF800000> : vector<1xf32>
    %14 = vector.multi_reduction <maximumf>, %13, %cst_12 [1] : vector<1x16xf32> to vector<1xf32>
    %15 = vector.shape_cast %14 : vector<1xf32> to vector<1x1xf32>
    %16 = vector.broadcast %15 : vector<1x1xf32> to vector<1x16xf32>
    %17 = arith.subf %13, %16 : vector<1x16xf32>
    %18 = math.exp %17 : vector<1x16xf32>
    %cst_13 = arith.constant dense<0.000000e+00> : vector<1xf32>
    %19 = vector.multi_reduction <add>, %18, %cst_13 [1] : vector<1x16xf32> to vector<1xf32>
    %20 = vector.shape_cast %19 : vector<1xf32> to vector<1x1xf32>
    %21 = vector.broadcast %20 : vector<1x1xf32> to vector<1x16xf32>
    %22 = arith.divf %18, %21 : vector<1x16xf32>
    %c0_14 = arith.constant 0 : index
    %c0_15 = arith.constant 0 : index
    %23 = vector.load %arg5[%c0_14, %c0_15] : memref<8x32xf32, #tpu.memory_space<vmem>>, vector<8x32xf32>
    %cst_16 = arith.constant dense<0.000000e+00> : vector<16x32xf32>
    %24 = tpu.matmul %1, %23, %cst_16 {dimension_numbers = #tpu.dot_dimension_numbers<[1], [0], [0], [1], [0, 0, 1, 1], [], []>} : vector<16x8xf32>, vector<8x32xf32>, vector<16x32xf32> -> vector<16x32xf32>
    %c0_17 = arith.constant 0 : index
    %c0_18 = arith.constant 0 : index
    %25 = vector.load %arg6[%c0_17, %c0_18] : memref<1x32xf32, #tpu.memory_space<vmem>>, vector<1x32xf32>
    %26 = vector.broadcast %25 : vector<1x32xf32> to vector<16x32xf32>
    %27 = arith.addf %24, %26 : vector<16x32xf32>
    %cst_19 = arith.constant dense<0.000000e+00> : vector<1x32xf32>
    %28 = tpu.matmul %22, %27, %cst_19 {dimension_numbers = #tpu.dot_dimension_numbers<[1], [0], [0], [1], [0, 0, 1, 1], [], []>} : vector<1x16xf32>, vector<16x32xf32>, vector<1x32xf32> -> vector<1x32xf32>
    %c0_20 = arith.constant 0 : index
    %c0_21 = arith.constant 0 : index
    %c0_22 = arith.constant 0 : index
    %29 = vector.load %arg7[%c0_20, %c0_21, %c0_22] : memref<1x1x32xf32, #tpu.memory_space<vmem>>, vector<1x1x32xf32>
    %30 = vector.shape_cast %29 : vector<1x1x32xf32> to vector<1x32xf32>
    %31 = vector.shape_cast %28 : vector<1x32xf32> to vector<1x1x32xf32>
    tpu.vector_store %arg7[%c0_20, %c0_21, %c0_22], %31 {strides = array<i32>} : memref<1x1x32xf32, #tpu.memory_space<vmem>>, vector<1x1x32xf32>,
    return
  }
  func.func @transform_0(%arg0: i32) -> (i32, i32, i32) {
    %c0_i32 = arith.constant 0 : i32
    %c0_i32_0 = arith.constant 0 : i32
    %c0_i32_1 = arith.constant 0 : i32
    return %arg0, %c0_i32, %c0_i32_0 : i32, i32, i32
  }
  func.func @transform_1(%arg0: i32) -> (i32, i32) {
    %c0_i32 = arith.constant 0 : i32
    %c0_i32_0 = arith.constant 0 : i32
    %c0_i32_1 = arith.constant 0 : i32
    return %c0_i32, %c0_i32_0 : i32, i32
  }
  func.func @transform_2(%arg0: i32) -> (i32, i32) {
    %c0_i32 = arith.constant 0 : i32
    %c0_i32_0 = arith.constant 0 : i32
    %c0_i32_1 = arith.constant 0 : i32
    return %c0_i32, %c0_i32_0 : i32, i32
  }
  func.func @transform_3(%arg0: i32) -> (i32, i32) {
    %c0_i32 = arith.constant 0 : i32
    %c0_i32_0 = arith.constant 0 : i32
    %c0_i32_1 = arith.constant 0 : i32
    return %c0_i32, %c0_i32_0 : i32, i32
  }
  func.func @transform_4(%arg0: i32) -> (i32, i32) {
    %c0_i32 = arith.constant 0 : i32
    %c0_i32_0 = arith.constant 0 : i32
    %c0_i32_1 = arith.constant 0 : i32
    return %c0_i32, %c0_i32_0 : i32, i32
  }
  func.func @transform_5(%arg0: i32) -> (i32, i32) {
    %c0_i32 = arith.constant 0 : i32
    %c0_i32_0 = arith.constant 0 : i32
    %c0_i32_1 = arith.constant 0 : i32
    return %c0_i32, %c0_i32_0 : i32, i32
  }
  func.func @transform_6(%arg0: i32) -> (i32, i32, i32) {
    %c0_i32 = arith.constant 0 : i32
    %c0_i32_0 = arith.constant 0 : i32
    %c0_i32_1 = arith.constant 0 : i32
    return %arg0, %c0_i32, %c0_i32_0 : i32, i32, i32
  }
}

</mosaic_0001>

<bundles_post_ra>
// kernel: tpu_custom_call.1
= control target key start
LH: loop header
LB: loop body
LE: loop exit
PB: predicated region body
PF: predicated region fallthrough
CT: control target
= control target key end

     0   :  { %11 = vsyncpa [#allocation3], 0  ;;  %s991_s0 = inlined_call_operand.vmem [shape: f32[4,16,8], index: 0, kind: input, shape index: {}]   ;;  %s992_s1 = inlined_call_operand.vmem [shape: f32[1,32], index: 1, kind: input, shape index: {}]   ;;  %s993_s2 = inlined_call_operand.vmem [shape: f32[8,32], index: 2, kind: input, shape index: {}]   ;;  %s994_s3 = inlined_call_operand.vmem [shape: f32[1,32], index: 3, kind: input, shape index: {}]   ;;  %s995_s4 = inlined_call_operand.vmem [shape: f32[8,32], index: 4, kind: input, shape index: {}]   ;;  %s996_s5 = inlined_call_operand.vmem [shape: f32[1,32], index: 5, kind: input, shape index: {}]   ;;  %s997_s6 = inlined_call_operand.hbm [shape: f32[4,1,32], index: 6, kind: output, shape index: {}]  }
   0x1   :  { %13 = vsyncpa [#allocation3 + $0x1], 0  ;;  %s866_s21 = smov 0   ;;  %s868_s22 = smov 0  }
   0x2   :  { %s870_s23 = smov 0   ;;  %s872_s24 = smov 0  }
   0x3 LB: > { %s887_s25 = sadd.s32 4294967295, %s825_s24   ;;  %s656_s26 = sadd.s32 4294967294, %s825_s24   ;;  %s825_s24 = sphi %s872_s24, %s1003_s24   ;;  %s821_s23 = sphi %s870_s23, %s1002_s23   ;;  %s817_s22 = sphi %s868_s22, %s1001_s22   ;;  %s813_s21 = sphi %s866_s21, %s1000_s21  }
   0x4   : > { %s891_s27 = sadd.s32 1, %s825_s24   ;;  %s157_s28 = sadd.s32 1, %s821_s23 }
   0x5   : > { %s154_s29 = ssub.s32 %s825_s24, %s891_s27  ;;  %p167_p0 = scmp.ne.s32.totalorder %s821_s23, %s817_s22 }
   0x6   : > { %p155_p1 = scmp.eq.s32.totalorder %s154_s29, 0  ;;  %p168_p2 = scmp.eq.s32.totalorder %s887_s25, 3 }
   0x7   : > { %p173_p3 = scmp.ne.s32.totalorder %s817_s22, %s813_s21  ;;  %p174_p4 = scmp.eq.s32.totalorder %s656_s26, 3 }
   0x8   : > { %s902_s30 = scalar_select %p155_p1, %s821_s23, %s157_s28  }
   0x9   : > { %p904_p5 = por %p168_p2, %p167_p0  ;;  %p908_p6 = por %p174_p4, %p173_p3 }
   0xa   : > { %p659_p7 = scmp.ge.s32.totalorder %s825_s24, 1  ;;  %p215_p8 = scmp.lt.s32.totalorder %s825_s24, 5 }
   0xc   : > { %p216_p9 = pnand %p659_p7, %p215_p8 }
   0xd   : > { %v252_v0 = vld [vmem:[%s993_s2] sm:$0xff] (!%p216_p9)  ;;  %vm253_vm0 = vcmask (!%p216_p9), 261120   ;;  %v827_v1 = vmov (!%p216_p9), 0.0   ;;  %vm828_vm1 = vmmov (!%p216_p9), 0   ;;  %p244_p10 = scmp.lt.s32.totalorder (!%p216_p9), %s887_s25, 3  ;;  %v829_v3 = vmov (!%p216_p9), 0.0|0.0  }
   0xe   : > { %219 = sbr.rel (%p216_p9) target bundleno = 986 (0x3da), region = 44  ;;  %686 = vmatprep.subr.mxu0 (!%p216_p9), %v827_v1  ;;  %688 = vmatprep.mubr.msk.f32.mxu0 (!%p216_p9), %vm828_vm1, %v827_v1  ;;  %v251_v2 = vld [vmem:[%s992_s1] sm:$0x1] (!%p216_p9)  ;;  %vm338_vm2 = vcmask (!%p216_p9), 64512   ;;  %vm333_vm4 = vcmask (!%p216_p9), 253952   ;;  %vm418_vm5 = vcmask (!%p216_p9), 122880  }
   0xf   : > { %687 = vmatpush3.xpose.msk.msra.mxu0 (!%p216_p9), %vm253_vm0, %v252_v0  ;;  %710 = vmatprep.subr.bf16.mxu1 (!%p216_p9), %v829_v3  ;;  %vm712_vm3 = vmpackc.low (!%p216_p9), %vm338_vm2, %vm338_vm2  ;;  %v331_v7 = vld [vmem:[%s994_s3] sm:$0x1] (!%p216_p9)  ;;  %vm513_vm6 = vcmask (!%p216_p9), 130048   ;;  %s242_s9 = sand.u32 (!%p216_p9), 1, %s817_s22   ;;  %s671_s10 = sshll.u32 (!%p216_p9), %s887_s25, 4 }
  0x10   : > { %695 = vmatprep.mubr.msk.f32.mxu1 (!%p216_p9), %vm828_vm1, %v827_v1  ;;  %v332_v8 = vmul.f32 (!%p216_p9), %v331_v7, %v251_v2  ;;  %v430_v13 = vld [vmem:[%s995_s4] sm:$0xff] (!%p216_p9)  ;;  %s243_s11 = scalar_lea.vmem (!%p216_p9), [#allocation2], %s242_s9  ;;  %s948_s15 = scalar_lea.hbm (!%p216_p9), %s997_s6, %s671_s10 }
  0x11   : > { %698 = vmatprep.subr.mxu0 (!%p216_p9), %v430_v13  ;;  %v667_v26 = vld [vmem:[%s996_s5] ss:$0 sm:$0xff] (!%p216_p9)  ;;  %s601_s12 = sshll.u32 (!%p216_p9), %s243_s11, 4  ;;  %s589_s16 = scalar_lea.sflag (!%p216_p9), [#allocation3], %s242_s9  ;;  %s950_s12 = int_to_ptr.vmem [resolvable:$true] %s601_s12 }
  0x12   : > { %689 = vmatmul.mubr.msk.f32.vlgmr.msra.gmra.mrb[0].mxu0 (!%p216_p9), %vm253_vm0, %v251_v2  ;;  %v334_v9 = vsel (!%p216_p9), %vm333_vm4, %v332_v8, 0.0 }
  0x13   : > { %335 = vadd.xlane.f32.xlu0 (!%p216_p9), %v334_v9  ;;  %699 = vmatpush3.msra.mxu0 (!%p216_p9), %v430_v13 }
  0x14   : > { %714 = vmatprep.subr.bf16.mxu0 (!%p216_p9), %v829_v3 }
  0x15   : > { %s245_s13 = scalar_select %p244_p10, %s887_s25, 3 }
  0x16   : > { %s830_s25 = smov [#allocation2]  }
  0x17   : > { %s674_s14 = sshll.u32 %s245_s13, 4  ;;  %s767_s18 = sshll.u32 %s830_s25, 4  ;;  %s768_s18 = int_to_ptr.vmem [resolvable:$false] %s767_s18 }
  0x18   : > { %s248_s17 = scalar_lea.vmem %s991_s0, %s674_s14  ;;  %s769_s19 = scalar_lea.vmem %s768_s18, 32 }
  0x19   : > { %v249_v4 = vld [vmem:[%s248_s17] sm:$0xff]  ;;  %v250_v5 = vld [vmem:[%s248_s17 + $0x8] sm:$0xff]  ;;  %s763_s17 = scalar_lea.vmem %s950_s12, 16  ;;  %p770_p0 = scmp.lt.s32.totalorder %s950_s12, %s768_s18 }
  0x1a   : > { %v711_v6 = vpack.c.bf16 %v250_v5, %v249_v4  ;;  %700 = vmatprep.mubr.msk.f32.mxu0 %vm338_vm2, %v249_v4  ;;  %p764_p11 = scmp.ne.s32.totalorder %s950_s12, %s763_s17  ;;  %p771_p1 = scmp.lt.s32.totalorder %s769_s19, %s763_s17 }
  0x1b   : > { %701 = vmatmul.mubr.msk.f32.vlgmr.msra.gmra.mrb[2].mxu0 %vm338_vm2, %v250_v5 }
  0x1c   : > { %713 = vmatpush3.bf16.xpose.msk.msra.mxu1 %vm712_vm3, %v711_v6  ;;  %707 = vmatprep.mubr.msk.f32.mxu0 %vm828_vm1, %v827_v1  ;;  %p765_p12 = pnand %p764_p11, %p904_p5  ;;  %p772_p2 = por %p771_p1, %p770_p0 }
  0x1e   : > { %p766_p13 = pneg %p765_p12 }
  0x20   : > { %p773_p3 = pnand %p772_p2, %p766_p13 }
  0xa0   : > { %v336_v14 = vpop.xlane.xlu0 %335 }
  0xa1   : > { %v337_v15 = vmul.f32 0.17677669, %v336_v14 }
  0xe5   : > { %v326_v10 = vpop.f32.mrb[0].mxu0 }
  0xe6   : > { %v330_v11 = vmul.f32 0.17677669, %v326_v10  ;;  %v690_v12 = vpop.f32.mrb[1].mxu0 }
  0xe8   : > { %696 = vmatmul.mubr.msk.f32.vlgmr.msra.gmra.mrb[0].mxu1 %vm338_vm2, %v330_v11 }
  0xee   : > { %v702_v25 = vpop.f32.mrb[2].mxu0 }
  0xef   : > { %v504_v27 = vpop.f32.mrb[3].mxu0  ;;  %v510_v28 = vadd.f32 %v702_v25, %v667_v26 }
  0xf0   : > { %v505_v29 = vadd.f32 %v667_v26, %v504_v27 }
  0xf2   : > { %v715_v30 = vpack.c.bf16 %v510_v28, %v505_v29 }
  0xf4   : > { %716 = vmatpush3.bf16.msra.mxu0 %v715_v30 }
 0x1bb   : > { %v414_v16 = vpop.f32.mrb[0].mxu1 }
 0x1bc   : > { %v415_v17 = vadd.f32 %v414_v16, %v337_v15  ;;  %v697_v18 = vpop.f32.mrb[1].mxu1 }
 0x1be   : > { %v419_v19 = vsel %vm418_vm5, %v415_v17, -inf }
 0x1bf   : > { %420 = vmax.xlane.f32.xlu0 %v419_v19 }
 0x24c   : > { %v421_v20 = vpop.xlane.xlu0 %420 }
 0x24d   : > { %v422_v21 = vsub.f32 %v415_v17, %v421_v20 }
 0x24f   : > { %v423_v22 = vmul.f32 1.442695, %v422_v21 }
 0x251   : > { %759 = vpow2.f32 %v423_v22 }
 0x25b   : > { %v760_v23 = vpop.eup %759 }
 0x25c   : > { %v425_v24 = vsel %vm418_vm5, %v760_v23, 0.0 }
 0x25d   : > { %426 = vadd.xlane.f32.xlu1 %v425_v24 }
 0x2ea   : > { %v427_v31 = vpop.xlane.xlu1 %426 }
 0x2eb   : > { %761 = vrcp.f32 %v427_v31 }
 0x2f5   : > { %v762_v32 = vpop.eup %761 }
 0x2f6   : > { %v429_v33 = vmul.f32 %v762_v32, %v760_v23 }
 0x2f8   : > { %708 = vmatmul.mubr.msk.f32.vlgmr.msra.gmra.mrb[4].mxu0 %vm513_vm6, %v429_v33 }
 0x3cb   : > { %v583_v34 = vpop.f32.mrb[4].mxu0 }
 0x3cc   : > { %587 = vst.msk [vmem:[%s243_s11] sm:$0x1] %vm333_vm4, %v583_v34  ;;  %v709_v35 = vpop.f32.mrb[5].mxu0 }
 0x3cd   : > { %776 = shalt.err (!%p773_p3)
}
 0x3ce   : > { %s777_s20 = scalar_lea.hbm %s948_s15, 16  ;;  %s781_s29 = scalar_lea.hbm %s997_s6, 64 }
 0x3cf   : > { %p778_p4 = scmp.ne.s32.totalorder %s948_s15, %s777_s20  ;;  %p782_p9 = scmp.lt.u32.totalorder %s948_s15, %s997_s6 }
 0x3d0   : > { %p783_p10 = scmp.lt.u32.totalorder %s781_s29, %s777_s20  ;;  %p785_p12 = scmp.lt.u32.totalorder %s777_s20, %s948_s15 }
 0x3d1   : > { %p779_p7 = pnand %p778_p4, %p904_p5 }
 0x3d2   : > { %p784_p11 = por %p783_p10, %p782_p9 }
 0x3d3   : > { %p780_p8 = pneg %p779_p7 }
 0x3d4   : > { %p786_p13 = por %p785_p12, %p784_p11 }
 0x3d6   : > { %p787_p0 = pnand %p786_p13, %p780_p8 }
 0x3d8   : > { %790 = shalt.err (!%p787_p0)
}
 0x3d9   : > { %717 = dma.vmem_to_hbm [thread:$0]  (%p904_p5), %s950_s12, 16, %s948_s15, %s589_s16  }
 0x3da PF: > { %p723_p1 = scmp.ge.s32.totalorder %s825_s24, 2  ;;  %s613_s11 = sand.u32 1, %s813_s21  }
 0x3db   : > { %s614_s13 = scalar_lea.sflag [#allocation3], %s613_s11 }
 0x3dc   : > { %p720_p2 = pnand %p723_p1, %p908_p6 }
 0x3de   : > { %808 = dma.done.wait (!%p720_p2), %s614_s13, 16  }
 0x3df   : > { %810 = vsyncadd (!%p720_p2), %s614_s13, 4294967280  ;;  %p16_p3 = scmp.ge.s32.totalorder %s891_s27, 6   ;;  %s1000_s21 = smov %s817_s22 }
 0x3e0   : > { %s1001_s22 = smov %s821_s23  ;;  %s1002_s23 = smov %s902_s30 }
 0x3e1   : > { %s1003_s24 = smov %s891_s27  ;;  %18 = sbr.rel (!%p16_p3) target bundleno = 3 (0x3), region = 79 }
 0x3e8   :  { %618 = vsyncpa [#allocation3], 1 }
 0x3e9   :  { %620 = vsyncpa [#allocation3 + $0x1], 1 }

</bundles_post_ra>
